<compile_context>
chip_gen: v6e
topology: v6e:2x2x1
jax: 0.10.0
libtpu: 0.0.40
codegen_flags: <defaults>
</compile_context>

<pallas_src>
import math
from functools import partial

import jax
import jax.numpy as jnp
from jax.experimental import pallas as pl
from jax.experimental.pallas import tpu as pltpu

TM = 256          # matmul row tile (MXU-filling on v6e/v7x, fine on v5e)
TK = 512          # K tile, used only when K > K_SINGLE
K_SINGLE = 2048   # keep the whole K dimension in one VMEM block below this
EW_TILE = 512     # target row tile for the mem-bound elementwise kernels


def _round_up(x, m):
    return (x + m - 1) // m * m


# ------------------------------ matmul + BN stats ----------------------------
def _mm_epilogue(i, y, o_ref, sum_ref, sq_ref, m_valid):
    """y: f32 accumulator tile (still in registers/VMEM). Stats exclude pad rows."""
    rows = i * y.shape[0] + jax.lax.broadcasted_iota(jnp.int32, y.shape, 0)
    ym = jnp.where(rows < m_valid, y, 0.0)
    sum_ref[...] = jnp.sum(ym, axis=0, keepdims=True).reshape(sum_ref.shape)
    sq_ref[...] = jnp.sum(ym * ym, axis=0, keepdims=True).reshape(sq_ref.shape)
    o_ref[...] = y.astype(o_ref.dtype)            # single (bf16) store of the tile


def _mm_stats_kernel(x_ref, w_ref, o_ref, sum_ref, sq_ref, acc_ref, *, m_valid):
    i, k = pl.program_id(0), pl.program_id(1)
    nk = pl.num_programs(1)
    prod = jnp.dot(x_ref[...], w_ref[...], preferred_element_type=jnp.float32)

    @pl.when(k == 0)
    def _():
        acc_ref[...] = prod

    @pl.when(k > 0)
    def _():
        acc_ref[...] += prod

    @pl.when(k == nk - 1)
    def _():
        _mm_epilogue(i, acc_ref[...], o_ref, sum_ref, sq_ref, m_valid)


def _mm_stats_fused_kernel(x_ref, sc_ref, sh_ref, w_ref, o_ref, sum_ref, sq_ref,
                           acc_ref, *, m_valid):
    """Same as above, but the previous layer's BN affine + ReLU is applied to the
    x tile on the VPU before the MXU dot (free filler under the MXU)."""
    i, k = pl.program_id(0), pl.program_id(1)
    nk = pl.num_programs(1)
    x = x_ref[...].astype(jnp.float32) * sc_ref[...] + sh_ref[...]
    x = jnp.maximum(x, 0.0).astype(jnp.bfloat16)
    prod = jnp.dot(x, w_ref[...], preferred_element_type=jnp.float32)

    @pl.when(k == 0)
    def _():
        acc_ref[...] = prod

    @pl.when(k > 0)
    def _():
        acc_ref[...] += prod

    @pl.when(k == nk - 1)
    def _():
        _mm_epilogue(i, acc_ref[...], o_ref, sum_ref, sq_ref, m_valid)


def matmul_stats_pallas(x, w, prologue=None, m_valid=None):
    """x: [Mp, K] bf16 (Mp % TM == 0), w: [K, N] bf16.
    prologue: optional (scale, shift) of shape (1, K): x := relu(x*scale+shift).
    Returns (y [Mp, N] bf16, col_sum [N] f32, col_sumsq [N] f32); the stats cover
    only the first m_valid rows (pad rows are masked out in the epilogue)."""
    Mp, K = x.shape
    Kw, N = w.shape
    assert Mp % TM == 0 and K == Kw
    if m_valid is None:
        m_valid = Mp

    if K <= K_SINGLE:
        kt = K
    else:                                 # K tiling keeps per-step VMEM bounded
        kt = TK
        pad = (-K) % kt
        if pad:
            x = jnp.pad(x, ((0, 0), (0, pad)))
            w = jnp.pad(w, ((0, pad), (0, 0)))
            if prologue is not None:
                prologue = tuple(jnp.pad(v, ((0, 0), (0, pad))) for v in prologue)
        K += pad
    nk = K // kt
    ni = Mp // TM

    x_spec = pl.BlockSpec((TM, kt), lambda i, k: (i, k))
    w_spec = pl.BlockSpec((kt, N), lambda i, k: (k, 0))
    vec_spec = pl.BlockSpec((1, kt), lambda i, k: (0, k))
    out_specs = (pl.BlockSpec((TM, N), lambda i, k: (i, 0)),
                 pl.BlockSpec((1, 1, N), lambda i, k: (i, 0, 0)),
                 pl.BlockSpec((1, 1, N), lambda i, k: (i, 0, 0)))
    out_shape = (jax.ShapeDtypeStruct((Mp, N), jnp.bfloat16),
                 jax.ShapeDtypeStruct((ni, 1, N), jnp.float32),
                 jax.ShapeDtypeStruct((ni, 1, N), jnp.float32))

    if prologue is None:
        kern = partial(_mm_stats_kernel, m_valid=m_valid)
        in_specs = [x_spec, w_spec]
        args = (x, w)
    else:
        scale, shift = prologue
        kern = partial(_mm_stats_fused_kernel, m_valid=m_valid)
        in_specs = [x_spec, vec_spec, vec_spec, w_spec]
        args = (x, scale.astype(jnp.float32), shift.astype(jnp.float32), w)

    y, psum, psq = pl.pallas_call(
        kern,
        out_shape=out_shape,
        grid=(ni, nk),
        in_specs=in_specs,
        out_specs=out_specs,
        scratch_shapes=[pltpu.VMEM((TM, N), jnp.float32)],
        compiler_params=pltpu.CompilerParams(
            dimension_semantics=("parallel", "arbitrary")),   # row axis -> 2 TCs on v7x
    )(*args)
    # tiny per-row-tile partial reduction finished in XLA
    return y, jnp.sum(psum, axis=(0, 1)), jnp.sum(psq, axis=(0, 1))


# ------------------------------ elementwise passes ---------------------------
def _bn_act_kernel(y_ref, sc_ref, sh_ref, o_ref, *, relu):
    out = y_ref[...].astype(jnp.float32) * sc_ref[...] + sh_ref[...]
    if relu:
        out = jnp.maximum(out, 0.0)
    o_ref[...] = out.astype(o_ref.dtype)


def bn_act_pallas(y, scale, shift, relu=True, out_dtype=jnp.bfloat16):
    """Fused BN affine (+ReLU).  y: [Mp, C].  Narrow channel counts are
    lane-packed to a 128-wide last dim so stores are unmasked; rows are padded
    up to a large tile instead of shrinking the tile."""
    Mp, C = y.shape
    r = 1
    if C < 128 and 128 % C == 0 and Mp % (128 // C) == 0:
        r = 128 // C
    yp = y.reshape(Mp // r, r * C)
    sc = jnp.tile(scale.reshape(1, C).astype(jnp.float32), (1, r))
    sh = jnp.tile(shift.reshape(1, C).astype(jnp.float32), (1, r))

    Mr, Cp = yp.shape
    tile = min(EW_TILE, _round_up(Mr, 8))
    Mpad = _round_up(Mr, tile)
    if Mpad != Mr:
        yp = jnp.pad(yp, ((0, Mpad - Mr), (0, 0)))

    row_spec = pl.BlockSpec((tile, Cp), lambda i: (i, 0))
    vec_spec = pl.BlockSpec((1, Cp), lambda i: (0, 0))
    out = pl.pallas_call(
        partial(_bn_act_kernel, relu=relu),
        out_shape=jax.ShapeDtypeStruct((Mpad, Cp), out_dtype),
        grid=(Mpad // tile,),
        in_specs=[row_spec, vec_spec, vec_spec],
        out_specs=row_spec,
        compiler_params=pltpu.CompilerParams(dimension_semantics=("parallel",)),
    )(yp, sc, sh)
    return out[:Mr].reshape(Mp, C)


def _bn_res_relu_kernel(y_ref, sc_ref, sh_ref, r_ref, rs_ref, rb_ref, o_ref):
    out = y_ref[...].astype(jnp.float32) * sc_ref[...] + sh_ref[...]
    out = out + r_ref[...].astype(jnp.float32) * rs_ref[...] + rb_ref[...]
    o_ref[...] = jnp.maximum(out, 0.0).astype(o_ref.dtype)


def bn_residual_relu_pallas(y, scale, shift, res, res_scale, res_shift,
                            out_dtype=jnp.float32):
    """out = relu(y*scale+shift + res*res_scale+res_shift); fuses bn3, the
    downsample-path BN affine and the residual add + final ReLU in one pass."""
    Mp, C = y.shape
    assert res.shape == (Mp, C)
    tile = min(EW_TILE, _round_up(Mp, 8))
    Mpad = _round_up(Mp, tile)
    if Mpad != Mp:
        y = jnp.pad(y, ((0, Mpad - Mp), (0, 0)))
        res = jnp.pad(res, ((0, Mpad - Mp), (0, 0)))

    row_spec = pl.BlockSpec((tile, C), lambda i: (i, 0))
    vec_spec = pl.BlockSpec((1, C), lambda i: (0, 0))
    v = lambda a: a.reshape(1, C).astype(jnp.float32)
    out = pl.pallas_call(
        _bn_res_relu_kernel,
        out_shape=jax.ShapeDtypeStruct((Mpad, C), out_dtype),
        grid=(Mpad // tile,),
        in_specs=[row_spec, vec_spec, vec_spec, row_spec, vec_spec, vec_spec],
        out_specs=row_spec,
        compiler_params=pltpu.CompilerParams(dimension_semantics=("parallel",)),
    )(y, v(scale), v(shift), res, v(res_scale), v(res_shift))
    return out[:Mp]


# --------------------------------- glue --------------------------------------
def _pad_rows(a, mult):
    extra = (-a.shape[0]) % mult
    return a if extra == 0 else jnp.pad(a, ((0, extra), (0, 0)))


def _bn_affine(ssum, ssq, gamma, beta, m, eps=1e-5):
    mean = ssum / m
    var = jnp.maximum(ssq / m - mean * mean, 0.0)   # clamp fp cancellation
    scale = gamma * jax.lax.rsqrt(var + eps)
    shift = beta - mean * scale
    return scale, shift


def _im2col(x, ksize, stride, pad):
    """x: [N, D, H, W, C] (bf16) -> patches [N*Do*Ho*Wo, ksize^3*C], offset-major,
    C-minor (matches the GEMM weight layout)."""
    # TODO(synk): replace this XLA-side materialization with an in-kernel 27-offset
    # K reduction (manual DMA of shifted (TM, C) slabs) to avoid the 27x HBM blowup.
    N, D, H, W, C = x.shape
    xp = jnp.pad(x, ((0, 0), (pad, pad), (pad, pad), (pad, pad), (0, 0)))
    Do = (D + 2 * pad - ksize) // stride + 1
    Ho = (H + 2 * pad - ksize) // stride + 1
    Wo = (W + 2 * pad - ksize) // stride + 1
    cols = []
    for kd in range(ksize):
        for kh in range(ksize):
            for kw in range(ksize):
                cols.append(xp[:, kd:kd + stride * Do:stride,
                               kh:kh + stride * Ho:stride,
                               kw:kw + stride * Wo:stride, :])
    patches = jnp.concatenate(cols, axis=-1)
    return patches.reshape(N * Do * Ho * Wo, ksize ** 3 * C), (N, Do, Ho, Wo)


def bottleneck_forward(x, p, eps=1e-5):
    """Bottleneck.forward: conv1x1-bn-relu -> conv3x3(stride)-bn-relu -> conv1x1-bn
    (+ downsample(x)) -> add -> relu.   x: NDHWC float32."""
    N, D, H, W, Cin = x.shape
    s = p["stride"]
    width = p["w1"].shape[1]
    outp = p["w3"].shape[1]

    # ---- conv1 (1x1): plain GEMM over flattened voxels, BN1 stats fused
    M1 = N * D * H * W
    x2d = _pad_rows(x.reshape(M1, Cin).astype(jnp.bfloat16), TM)
    y1, s1, q1 = matmul_stats_pallas(x2d, p["w1"], m_valid=M1)
    sc1, sh1 = _bn_affine(s1, q1, p["bn1_g"], p["bn1_b"], M1, eps)

    # ---- bn1 + relu (standalone, bf16 out): conv2's zero padding applies AFTER
    #      bn+relu, so this pass cannot be folded into conv2's GEMM prologue.
    o1 = bn_act_pallas(y1, sc1, sh1, relu=True, out_dtype=jnp.bfloat16)[:M1]
    o1 = o1.reshape(N, D, H, W, width)

    # ---- conv2 (3x3x3, stride s, pad 1): bf16 im2col GEMM, BN2 stats fused
    patches, (_, Do, Ho, Wo) = _im2col(o1, 3, s, 1)
    M2 = N * Do * Ho * Wo
    y2, s2, q2 = matmul_stats_pallas(_pad_rows(patches, TM), p["w2"], m_valid=M2)
    sc2, sh2 = _bn_affine(s2, q2, p["bn2_g"], p["bn2_b"], M2, eps)

    # ---- conv3 (1x1): bn2+relu fused into the GEMM x prologue; BN3 stats fused
    y3, s3, q3 = matmul_stats_pallas(
        y2, p["w3"],
        prologue=(sc2.reshape(1, -1), sh2.reshape(1, -1)),
        m_valid=M2)
    sc3, sh3 = _bn_affine(s3, q3, p["bn3_g"], p["bn3_b"], M2, eps)

    # ---- identity path
    if "ds_w" in p:                                 # conv1x1(stride s) + BN
        xs = x[:, ::s, ::s, ::s, :]
        xs2d = _pad_rows(xs.reshape(M2, Cin).astype(jnp.bfloat16), TM)
        yd, sd, qd = matmul_stats_pallas(xs2d, p["ds_w"], m_valid=M2)
        rsc, rsh = _bn_affine(sd, qd, p["ds_bn_g"], p["ds_bn_b"], M2, eps)
        res = yd                                    # BN applied in the final pass
    else:                                           # stride==1, Cin == outp
        res = _pad_rows(x.reshape(M1, Cin), TM)
        rsc = jnp.ones((outp,), jnp.float32)
        rsh = jnp.zeros((outp,), jnp.float32)

    # ---- bn3 + residual(+ds-BN) + relu in one fused elementwise pass
    out = bn_residual_relu_pallas(y3, sc3, sh3, res, rsc, rsh)[:M2]
    return out.reshape(N, Do, Ho, Wo, outp)


# ------------------------------ parameter init -------------------------------
def _gemm_weight(w):
    """PyTorch conv weight [Cout, Cin, kD, kH, kW] -> GEMM [(kD*kH*kW*Cin), Cout] bf16."""
    cout, cin, kd, kh, kw = w.shape
    return jnp.transpose(w, (2, 3, 4, 1, 0)).reshape(kd * kh * kw * cin, cout) \
              .astype(jnp.bfloat16)


def init_bottleneck_params(key, inplanes, planes, stride=1, base_width=64, groups=1):
    # TODO(synk): only groups=1 / dilation=1 (the module defaults) are supported.
    assert groups == 1
    keys = iter(jax.random.split(key, 16))

    def conv_w(cout, cin, k):
        fan_out = cout * k ** 3                     # kaiming_normal_, fan_out, relu
        std = math.sqrt(2.0 / fan_out)
        return jax.random.normal(next(keys), (cout, cin, k, k, k), jnp.float32) * std

    width = int(planes * (base_width / 64.0)) * groups
    outp = planes * 4                               # Bottleneck.expansion = 4
    ones = lambda c: jnp.ones((c,), jnp.float32)
    zeros = lambda c: jnp.zeros((c,), jnp.float32)
    p = {
        "stride": stride,
        "w1": _gemm_weight(conv_w(width, inplanes, 1)),
        "bn1_g": ones(width), "bn1_b": zeros(width),
        "w2": _gemm_weight(conv_w(width, width, 3)),
        "bn2_g": ones(width), "bn2_b": zeros(width),
        "w3": _gemm_weight(conv_w(outp, width, 1)),
        "bn3_g": ones(outp), "bn3_b": zeros(outp),
    }
    if stride != 1 or inplanes != outp:             # downsample = conv1x1 + BN
        p["ds_w"] = _gemm_weight(conv_w(outp, inplanes, 1))
        p["ds_bn_g"], p["ds_bn_b"] = ones(outp), zeros(outp)
    return p


if __name__ == "__main__":
    key = jax.random.PRNGKey(0)
    kp, kx = jax.random.split(key)

    # Bottleneck(inplanes=64, planes=32, stride=2) with a conv1x1+BN downsample.
    inplanes, planes, stride = 64, 32, 2
    params = init_bottleneck_params(kp, inplanes, planes, stride=stride)

    # NDHWC input; equivalent to a PyTorch NCDHW input of shape (2, 64, 8, 8, 8).
    x = jax.random.normal(kx, (2, 8, 8, 8, inplanes), jnp.float32)

    out = bottleneck_forward(x, params)
    out = jax.block_until_ready(out)

    # stride-2 bottleneck: spatial 8 -> 4, channels -> planes * expansion = 128
    assert out.shape == (2, 4, 4, 4, planes * 4), out.shape
    assert bool(jnp.all(jnp.isfinite(out)))
    assert bool(jnp.all(out >= 0.0))                # final ReLU
    print("KERNEL_OK")
</pallas_src>

<mosaic_0001>
module attributes {stable_mosaic.version = 11 : i64} {
  func.func @_mm_stats_kernel(%arg0: i32, %arg1: i32, %arg2: memref<256x64xbf16, #tpu.memory_space<vmem>>, %arg3: memref<64x32xbf16, #tpu.memory_space<vmem>>, %arg4: memref<256x32xbf16, #tpu.memory_space<vmem>>, %arg5: memref<1x1x32xf32, #tpu.memory_space<vmem>>, %arg6: memref<1x1x32xf32, #tpu.memory_space<vmem>>, %arg7: memref<256x32xf32, #tpu.memory_space<vmem>>) attributes {dimension_semantics = [#tpu.dimension_semantics<parallel>, #tpu.dimension_semantics<arbitrary>], iteration_bounds = array<i64: 4, 1>, scalar_prefetch = 0 : i64, scratch_operands = 1 : i64, tpu.core_type = #tpu.core_type<tc>, window_params = [{transform_indices = @transform_0, window_bounds = array<i64: 256, 64>}, {transform_indices = @transform_1, window_bounds = array<i64: 64, 32>}, {transform_indices = @transform_2, window_bounds = array<i64: 256, 32>}, {transform_indices = @transform_3, window_bounds = array<i64: 1, 1, 32>}, {transform_indices = @transform_4, window_bounds = array<i64: 1, 1, 32>}]} {
    %c0 = arith.constant 0 : index
    %c0_0 = arith.constant 0 : index
    %0 = vector.load %arg2[%c0, %c0_0] : memref<256x64xbf16, #tpu.memory_space<vmem>>, vector<256x64xbf16>
    %c0_1 = arith.constant 0 : index
    %c0_2 = arith.constant 0 : index
    %1 = vector.load %arg3[%c0_1, %c0_2] : memref<64x32xbf16, #tpu.memory_space<vmem>>, vector<64x32xbf16>
    %cst = arith.constant dense<0.000000e+00> : vector<256x32xf32>
    %2 = tpu.matmul %0, %1, %cst {dimension_numbers = #tpu.dot_dimension_numbers<[1], [0], [0], [1], [0, 0, 1, 1], [], []>} : vector<256x64xbf16>, vector<64x32xbf16>, vector<256x32xf32> -> vector<256x32xf32>
    %c0_i32 = arith.constant 0 : i32
    %3 = arith.cmpi eq, %arg1, %c0_i32 : i32
    %4 = arith.extui %3 : i1 to i32
    %c0_i32_3 = arith.constant 0 : i32
    %5 = arith.cmpi ne, %4, %c0_i32_3 : i32
    scf.if %5 {
      %c0_8 = arith.constant 0 : index
      %c0_9 = arith.constant 0 : index
      %12 = vector.load %arg7[%c0_8, %c0_9] : memref<256x32xf32, #tpu.memory_space<vmem>>, vector<256x32xf32>
      tpu.vector_store %arg7[%c0_8, %c0_9], %2 {strides = array<i32>} : memref<256x32xf32, #tpu.memory_space<vmem>>, vector<256x32xf32>,
    } else {
    }
    %c0_i32_4 = arith.constant 0 : i32
    %6 = arith.cmpi sgt, %arg1, %c0_i32_4 : i32
    %7 = arith.extui %6 : i1 to i32
    %c0_i32_5 = arith.constant 0 : i32
    %8 = arith.cmpi ne, %7, %c0_i32_5 : i32
    scf.if %8 {
      %c0_8 = arith.constant 0 : index
      %c0_9 = arith.constant 0 : index
      %12 = vector.load %arg7[%c0_8, %c0_9] : memref<256x32xf32, #tpu.memory_space<vmem>>, vector<256x32xf32>
      %13 = arith.addf %12, %2 : vector<256x32xf32>
      %c0_10 = arith.constant 0 : index
      %c0_11 = arith.constant 0 : index
      %14 = vector.load %arg7[%c0_10, %c0_11] : memref<256x32xf32, #tpu.memory_space<vmem>>, vector<256x32xf32>
      tpu.vector_store %arg7[%c0_10, %c0_11], %13 {strides = array<i32>} : memref<256x32xf32, #tpu.memory_space<vmem>>, vector<256x32xf32>,
    } else {
    }
    %c0_i32_6 = arith.constant 0 : i32
    %9 = arith.cmpi eq, %arg1, %c0_i32_6 : i32
    %10 = arith.extui %9 : i1 to i32
    %c0_i32_7 = arith.constant 0 : i32
    %11 = arith.cmpi ne, %10, %c0_i32_7 : i32
    scf.if %11 {
      %c0_8 = arith.constant 0 : index
      %c0_9 = arith.constant 0 : index
      %12 = vector.load %arg7[%c0_8, %c0_9] : memref<256x32xf32, #tpu.memory_space<vmem>>, vector<256x32xf32>
      %c256_i32 = arith.constant 256 : i32
      %13 = arith.muli %arg0, %c256_i32 : i32
      %14 = tpu.iota {dimensions = array<i32: 0>} : vector<256x32xi32>
      %15 = vector.broadcast %13 : i32 to vector<256x32xi32>
      %16 = arith.addi %15, %14 : vector<256x32xi32>
      %c1024_i32 = arith.constant 1024 : i32
      %17 = vector.broadcast %c1024_i32 : i32 to vector<256x32xi32>
      %18 = arith.cmpi slt, %16, %17 : vector<256x32xi32>
      %cst_10 = arith.constant 0.000000e+00 : f32
      %19 = vector.broadcast %cst_10 : f32 to vector<256x32xf32>
      %20 = arith.select %18, %12, %19 : vector<256x32xi1>, vector<256x32xf32>
      %cst_11 = arith.constant dense<0.000000e+00> : vector<32xf32>
      %21 = vector.multi_reduction <add>, %20, %cst_11 [0] : vector<256x32xf32> to vector<32xf32>
      %22 = vector.shape_cast %21 : vector<32xf32> to vector<1x32xf32>
      %23 = vector.shape_cast %22 : vector<1x32xf32> to vector<1x1x32xf32>
      %c0_12 = arith.constant 0 : index
      %c0_13 = arith.constant 0 : index
      %c0_14 = arith.constant 0 : index
      %24 = vector.load %arg5[%c0_12, %c0_13, %c0_14] : memref<1x1x32xf32, #tpu.memory_space<vmem>>, vector<1x1x32xf32>
      tpu.vector_store %arg5[%c0_12, %c0_13, %c0_14], %23 {strides = array<i32>} : memref<1x1x32xf32, #tpu.memory_space<vmem>>, vector<1x1x32xf32>,
      %25 = arith.mulf %20, %20 : vector<256x32xf32>
      %cst_15 = arith.constant dense<0.000000e+00> : vector<32xf32>
      %26 = vector.multi_reduction <add>, %25, %cst_15 [0] : vector<256x32xf32> to vector<32xf32>
      %27 = vector.shape_cast %26 : vector<32xf32> to vector<1x32xf32>
      %28 = vector.shape_cast %27 : vector<1x32xf32> to vector<1x1x32xf32>
      %c0_16 = arith.constant 0 : index
      %c0_17 = arith.constant 0 : index
      %c0_18 = arith.constant 0 : index
      %29 = vector.load %arg6[%c0_16, %c0_17, %c0_18] : memref<1x1x32xf32, #tpu.memory_space<vmem>>, vector<1x1x32xf32>
      tpu.vector_store %arg6[%c0_16, %c0_17, %c0_18], %28 {strides = array<i32>} : memref<1x1x32xf32, #tpu.memory_space<vmem>>, vector<1x1x32xf32>,
      %30 = arith.truncf %12 : vector<256x32xf32> to vector<256x32xbf16>
      %c0_19 = arith.constant 0 : index
      %c0_20 = arith.constant 0 : index
      %31 = vector.load %arg4[%c0_19, %c0_20] : memref<256x32xbf16, #tpu.memory_space<vmem>>, vector<256x32xbf16>
      tpu.vector_store %arg4[%c0_19, %c0_20], %30 {strides = array<i32>} : memref<256x32xbf16, #tpu.memory_space<vmem>>, vector<256x32xbf16>,
    } else {
    }
    return
  }
  func.func @transform_0(%arg0: i32, %arg1: i32) -> (i32, i32) {
    %c0_i32 = arith.constant 0 : i32
    return %arg0, %arg1 : i32, i32
  }
  func.func @transform_1(%arg0: i32, %arg1: i32) -> (i32, i32) {
    %c0_i32 = arith.constant 0 : i32
    %c0_i32_0 = arith.constant 0 : i32
    return %arg1, %c0_i32 : i32, i32
  }
  func.func @transform_2(%arg0: i32, %arg1: i32) -> (i32, i32) {
    %c0_i32 = arith.constant 0 : i32
    %c0_i32_0 = arith.constant 0 : i32
    return %arg0, %c0_i32 : i32, i32
  }
  func.func @transform_3(%arg0: i32, %arg1: i32) -> (i32, i32, i32) {
    %c0_i32 = arith.constant 0 : i32
    %c0_i32_0 = arith.constant 0 : i32
    %c0_i32_1 = arith.constant 0 : i32
    return %arg0, %c0_i32, %c0_i32_0 : i32, i32, i32
  }
  func.func @transform_4(%arg0: i32, %arg1: i32) -> (i32, i32, i32) {
    %c0_i32 = arith.constant 0 : i32
    %c0_i32_0 = arith.constant 0 : i32
    %c0_i32_1 = arith.constant 0 : i32
    return %arg0, %c0_i32, %c0_i32_0 : i32, i32, i32
  }
}

</mosaic_0001>

<bundles_post_ra>
// kernel: tpu_custom_call.1
= control target key start
LH: loop header
LB: loop body
LE: loop exit
PB: predicated region body
PF: predicated region fallthrough
CT: control target
= control target key end

     0   :  { %10 = vsyncpa [#allocation4], 0  ;;  %s2487_s0 = inlined_call_operand.vmem [shape: bf16[1024,64], index: 0, kind: input, shape index: {}]   ;;  %s2488_s1 = inlined_call_operand.vmem [shape: bf16[64,32], index: 1, kind: input, shape index: {}]   ;;  %s2489_s2 = inlined_call_operand.vmem [shape: bf16[1024,32], index: 2, kind: output, shape index: {0}]   ;;  %s2490_s3 = inlined_call_operand.hbm [shape: f32[4,1,32], index: 3, kind: output, shape index: {1}]   ;;  %s2491_s4 = inlined_call_operand.hbm [shape: f32[4,1,32], index: 4, kind: output, shape index: {2}]  }
   0x1   :  { %12 = vsyncpa [#allocation4 + $0x1], 0 }
   0x2   :  { %13 = vsyncpa [#allocation6], 0 }
   0x3   :  { %15 = vsyncpa [#allocation6 + $0x1], 0  ;;  %s1830_s15 = smov 0   ;;  %s1832_s16 = smov 0  }
   0x4   :  { %s1834_s17 = smov 0   ;;  %s1836_s18 = smov 0  }
   0x5   :  { %s1838_s19 = smov 0   ;;  %s1840_s20 = smov 0  }
   0x6 LB: > { %s1432_s21 = sadd.s32 4294967295, %s1801_s20   ;;  %s1433_s22 = sadd.s32 4294967294, %s1801_s20   ;;  %s1801_s20 = sphi %s1840_s20, %s21_s20   ;;  %s1797_s19 = sphi %s1838_s19, %s2498_s19   ;;  %s1793_s18 = sphi %s1836_s18, %s2497_s18   ;;  %s1789_s17 = sphi %s1834_s17, %s2496_s17   ;;  %s1785_s16 = sphi %s1832_s16, %s2495_s16   ;;  %s1781_s15 = sphi %s1830_s15, %s2494_s15  }
   0x7   : > { %s33_s23 = sadd.s32 1, %s1797_s19  ;;  %s120_s24 = sadd.s32 1, %s1789_s17 }
   0x8   : > { %p35_p0 = scmp.ge.s32.totalorder %s33_s23, 4  ;;  %p130_p1 = scmp.ne.s32.totalorder %s1789_s17, %s1785_s16 }
   0x9   : > { %p131_p2 = scmp.eq.s32.totalorder %s1432_s21, 3  ;;  %p136_p3 = scmp.ne.s32.totalorder %s1785_s16, %s1781_s15 }
   0xa   : > { %s2500_s23 = smov (%p35_p0, %s33_s23), 0  ;;  %p137_p5 = scmp.eq.s32.totalorder %s1433_s22, 3 }
   0xb   : > { %p1870_p4 = por %p131_p2, %p130_p1  ;;  %s117_s26 = ssub.s32 %s1797_s19, %s2500_s23 }
   0xc   : > { %p1437_p6 = scmp.ge.s32.totalorder %s1801_s20, 1  ;;  %p118_p7 = scmp.eq.s32.totalorder %s117_s26, 0 }
   0xd   : > { %p1877_p8 = por %p137_p5, %p136_p3  ;;  %p202_p9 = scmp.lt.s32.totalorder %s1801_s20, 5 }
   0xe   : > { %s1883_s28 = scalar_select %p118_p7, %s1789_s17, %s120_s24  }
   0xf   : > { %p203_p10 = pnand %p1437_p6, %p202_p9 }
  0x10   : > { %s1438_s5 = sshll.u32 (!%p203_p10), %s1793_s18, 5  ;;  %s1478_s22 = sshll.u32 (!%p203_p10), %s1793_s18, 8 }
  0x11   : > { %206 = sbr.rel (%p203_p10) target bundleno = 358 (0x166), region = 28  ;;  %p245_p11 = scmp.lt.s32.totalorder (!%p203_p10), %s1438_s5, 127 }
  0x12   : > { %s2398_s30 = sand.u32 (!%p203_p10), 1, %s1785_s16   ;;  %s1803_s24 = smov (!%p203_p10), [#allocation3]  }
  0x13   : > { %s237_s6 = scalar_lea.vmem (!%p203_p10), [#allocation3], %s2398_s30  ;;  %s243_s8 = scalar_lea.vmem (!%p203_p10), [#allocation5], %s2398_s30 }
  0x14   : > { %s1285_s7 = sshll.u32 (!%p203_p10), %s237_s6, 4  ;;  %s1298_s9 = sshll.u32 (!%p203_p10), %s243_s8, 4  ;;  %s2410_s7 = int_to_ptr.vmem [resolvable:$true] %s1285_s7  ;;  %s2418_s9 = int_to_ptr.vmem [resolvable:$true] %s1298_s9 }
  0x15   : > { %s1265_s21 = scalar_lea.sflag (!%p203_p10), [#allocation4], %s2398_s30  ;;  %s1699_s26 = sshll.u32 (!%p203_p10), %s1803_s24, 4  ;;  %s1700_s26 = int_to_ptr.vmem [resolvable:$false] %s1699_s26 }
  0x16   : > { %v1675_v0 = vld [vmem:[%s2488_s1 + $0x18] sm:$0xff]   ;;  %v1676_v1 = vld [vmem:[%s2488_s1 + $0x10] sm:$0xff]   ;;  %s2502_s5 = smov (!%p245_p11, %s1438_s5), 127  ;;  %v1677_v2 = vld [vmem:[%s2488_s1 + $0x8] sm:$0xff]   ;;  %vm410_vm0 = vcmask 523264   ;;  %v794_v20 = vlaneseq  ;;  %v1944_v23 = vstv %s1478_s22  ;;  %vm624_vm1 = vcmask 261120   ;;  %p1702_p1 = scmp.lt.s32.totalorder %s2410_s7, %s1700_s26 }
  0x17   : > { %1567 = vmatprep.subr.bf16.mxu0 %v1675_v0  ;;  %1607 = vmatprep.subr.bf16.mxu1 %v1675_v0  ;;  %s1439_s10 = sshll.u32 %s2502_s5, 2  ;;  %v1678_v4 = vld [vmem:[%s2488_s1] sm:$0xff]   ;;  %vm1226_vm3 = vcmask 257024   ;;  %s1511_s5 = sshll.u32 %s1793_s18, 4 }
  0x18   : > { %1568 = vmatpush3.bf16.msra.mxu0 %v1675_v0  ;;  %1611 = vmatpush3.bf16.msra.mxu1 %v1675_v0  ;;  %s1903_s13 = scalar_lea.vmem %s2487_s0, %s1439_s10  ;;  %v1940_v21 = vshrl.u32 %v794_v20, 7  ;;  %s2015_s29 = scalar_lea.vmem %s2489_s2, %s1439_s10 }
  0x19   : > { %1569 = vmatprep.subr.bf16.mxu0 %v1676_v1  ;;  %1608 = vmatprep.subr.bf16.mxu1 %v1676_v1  ;;  %v1679_v3 = vld [vmem:[%s1903_s13] sm:$0xff]   ;;  %v1680_v5 = vld [vmem:[%s1903_s13 + $0x8] sm:$0xff]   ;;  %v1681_v6 = vld [vmem:[%s1903_s13 + $0x10] sm:$0xff]   ;;  %s2408_s12 = scalar_lea.hbm %s2490_s3, %s1511_s5  ;;  %s2416_s14 = scalar_lea.hbm %s2491_s4, %s1511_s5 }
  0x1a   : > { %1575 = vmatprep.mubr.msk.bf16.mxu0 %vm410_vm0, %v1679_v3  ;;  %v1687_v7 = vld [vmem:[%s1903_s13 + $0x40] sm:$0xff]   ;;  %v1688_v8 = vld [vmem:[%s1903_s13 + $0x48] sm:$0xff]   ;;  %v1689_v9 = vld [vmem:[%s1903_s13 + $0x50] sm:$0xff]   ;;  %v797_v22 = vadd.s32 16, %v1940_v21  ;;  %v798_v24 = vadd.s32 24, %v1940_v21  ;;  %v796_v25 = vadd.s32 8, %v1940_v21  ;;  %v1955_v30 = vadd.s32 %v1944_v23, %v1940_v21 }
  0x1b   : > { %1591 = vmatprep.mubr.msk.bf16.mxu1 %vm410_vm0, %v1687_v7  ;;  %v1682_v10 = vld [vmem:[%s1903_s13 + $0x18] sm:$0xff]   ;;  %v1683_v12 = vld [vmem:[%s1903_s13 + $0x20] sm:$0xff]   ;;  %v1684_v14 = vld [vmem:[%s1903_s13 + $0x28] sm:$0xff]   ;;  %v799_v28 = vadd.s32 32, %v1940_v21  ;;  %v801_v33 = vadd.s32 48, %v1940_v21  ;;  %v802_v35 = vadd.s32 56, %v1940_v21 }
  0x1c   : > { %1570 = vmatpush3.bf16.msra.mxu0 %v1676_v1  ;;  %1612 = vmatpush3.bf16.msra.mxu1 %v1676_v1  ;;  %v1690_v11 = vld [vmem:[%s1903_s13 + $0x58] sm:$0xff]   ;;  %v1691_v13 = vld [vmem:[%s1903_s13 + $0x60] sm:$0xff]   ;;  %v1692_v15 = vld [vmem:[%s1903_s13 + $0x68] sm:$0xff]   ;;  %v1949_v27 = vadd.s32 %v1944_v23, %v797_v22  ;;  %v1958_v31 = vadd.s32 %v1944_v23, %v798_v24  ;;  %v1961_v32 = vadd.s32 %v1944_v23, %v796_v25  ;;  %v800_v36 = vadd.s32 40, %v1940_v21  ;;  %s1695_s22 = scalar_lea.vmem %s2410_s7, 16 }
  0x1d   : > { %1571 = vmatprep.subr.bf16.mxu0 %v1677_v2  ;;  %1609 = vmatprep.subr.bf16.mxu1 %v1677_v2  ;;  %v1685_v16 = vld [vmem:[%s1903_s13 + $0x30] sm:$0xff]   ;;  %v1686_v18 = vld [vmem:[%s1903_s13 + $0x38] sm:$0xff]   ;;  %v805_v37 = vadd.s32 80, %v1940_v21  ;;  %v803_v39 = vadd.s32 64, %v1940_v21  ;;  %v806_v40 = vadd.s32 88, %v1940_v21  ;;  %v804_v41 = vadd.s32 72, %v1940_v21  ;;  %p1696_p12 = scmp.ne.s32.totalorder %s2410_s7, %s1695_s22 }
  0x1e   : > { %v1693_v17 = vld [vmem:[%s1903_s13 + $0x70] sm:$0xff]   ;;  %v1694_v19 = vld [vmem:[%s1903_s13 + $0x78] sm:$0xff]   ;;  %v809_v42 = vadd.s32 112, %v1940_v21  ;;  %vm862_vm2 = vcmp.lt.s32.totalorder %v1949_v27, 1024  ;;  %v1976_v44 = vadd.s32 %v1944_v23, %v799_v28  ;;  %vm860_vm4 = vcmp.lt.s32.totalorder %v1955_v30, 1024 }
  0x1f   : > { %vm863_vm5 = vcmp.lt.s32.totalorder %v1958_v31, 1024  ;;  %vm861_vm6 = vcmp.lt.s32.totalorder %v1961_v32, 1024  ;;  %v1983_v46 = vadd.s32 %v1944_v23, %v801_v33  ;;  %v1987_v48 = vadd.s32 %v1944_v23, %v802_v35  ;;  %p1697_p13 = pnand %p1696_p12, %p1870_p4 }
  0x20   : > { %1572 = vmatpush3.bf16.msra.mxu0 %v1677_v2  ;;  %1613 = vmatpush3.bf16.msra.mxu1 %v1677_v2  ;;  %v1990_v49 = vadd.s32 %v1944_v23, %v800_v36  ;;  %v1993_v50 = vadd.s32 %v1944_v23, %v805_v37  ;;  %v807_v51 = vadd.s32 96, %v1940_v21  ;;  %v1998_v53 = vadd.s32 %v1944_v23, %v803_v39 }
  0x21   : > { %1573 = vmatprep.subr.bf16.mxu0 %v1678_v4  ;;  %1610 = vmatprep.subr.bf16.mxu1 %v1678_v4  ;;  %v2001_v54 = vadd.s32 %v1944_v23, %v806_v40  ;;  %v2004_v55 = vadd.s32 %v1944_v23, %v804_v41  ;;  %v2007_v56 = vadd.s32 %v1944_v23, %v809_v42  ;;  %vm864_vm7 = vcmp.lt.s32.totalorder %v1976_v44, 1024  ;;  %p1698_p0 = pneg %p1697_p13 }
  0x22   : > { %v813_v60 = vadd.s32 144, %v1940_v21  ;;  %v810_v61 = vadd.s32 120, %v1940_v21  ;;  %v811_v62 = vadd.s32 128, %v1940_v21  ;;  %v808_v63 = vadd.s32 104, %v1940_v21 }
  0x23   : > { %v814_v3 = vadd.s32 152, %v1940_v21  ;;  %vm866_vm8 = vcmp.lt.s32.totalorder %v1983_v46, 1024  ;;  %v2032_v7 = vadd.s32 %v1944_v23, %v807_v51  ;;  %vm867_vm9 = vcmp.lt.s32.totalorder %v1987_v48, 1024 }
  0x24   : > { %1574 = vmatpush3.bf16.msra.mxu0 %v1678_v4  ;;  %1614 = vmatpush3.bf16.msra.mxu1 %v1678_v4  ;;  %v812_v4 = vadd.s32 136, %v1940_v21  ;;  %vm865_vm10 = vcmp.lt.s32.totalorder %v1990_v49, 1024  ;;  %v2056_v20 = vadd.s32 %v1944_v23, %v810_v61  ;;  %v2059_v22 = vadd.s32 %v1944_v23, %v811_v62 }
  0x25   : > { %v2062_v24 = vadd.s32 %v1944_v23, %v808_v63  ;;  %vm868_vm11 = vcmp.lt.s32.totalorder %v1998_v53, 1024  ;;  %v2110_v62 = vadd.s32 192, %v1940_v21  ;;  %vm870_vm12 = vcmp.lt.s32.totalorder %v1993_v50, 1024 }
  0x26   : > { %v2075_v30 = vadd.s32 %v1944_v23, %v812_v4  ;;  %vm871_vm13 = vcmp.lt.s32.totalorder %v2001_v54, 1024  ;;  %vm869_vm14 = vcmp.lt.s32.totalorder %v2004_v55, 1024 }
  0x27   : > { %1576 = vmatmul.mubr.msk.bf16.vlgmr.msra.gmra.mxu0 %vm410_vm0, %v1680_v5  ;;  %1592 = vmatmul.mubr.msk.bf16.vlgmr.msra.gmra.mxu1 %vm410_vm0, %v1688_v8 }
  0x28   : > { %1579 = vmatprep.mubr.msk.bf16.mxu0 %vm410_vm0, %v1681_v6  ;;  %1595 = vmatprep.mubr.msk.bf16.mxu1 %vm410_vm0, %v1689_v9  ;;  %v817_v9 = vadd.s32 176, %v1940_v21 }
  0x2a   : > { %v2081_v36 = vadd.s32 %v1944_v23, %v817_v9 }
  0x2f   : > { %1580 = vmatmul.mubr.msk.bf16.gmra.mxu0 %vm410_vm0, %v1682_v10  ;;  %1596 = vmatmul.mubr.msk.bf16.gmra.mxu1 %vm410_vm0, %v1690_v11  ;;  %v815_v11 = vadd.s32 160, %v1940_v21 }
  0x30   : > { %1583 = vmatprep.mubr.msk.bf16.mxu0 %vm410_vm0, %v1683_v12  ;;  %1599 = vmatprep.mubr.msk.bf16.mxu1 %vm410_vm0, %v1691_v13  ;;  %v816_v12 = vadd.s32 168, %v1940_v21 }
  0x31   : > { %v2084_v37 = vadd.s32 %v1944_v23, %v815_v11 }
  0x32   : > { %v2087_v39 = vadd.s32 %v1944_v23, %v816_v12 }
  0x37   : > { %1584 = vmatmul.mubr.msk.bf16.gmra.mxu0 %vm410_vm0, %v1684_v14  ;;  %1600 = vmatmul.mubr.msk.bf16.gmra.mxu1 %vm410_vm0, %v1692_v15 }
  0x38   : > { %1587 = vmatprep.mubr.msk.bf16.mxu0 %vm410_vm0, %v1685_v16  ;;  %1603 = vmatprep.mubr.msk.bf16.mxu1 %vm410_vm0, %v1693_v17  ;;  %v818_v16 = vadd.s32 184, %v1940_v21 }
  0x3f   : > { %1588 = vmatmul.mubr.msk.bf16.gmra.mxu0 %vm410_vm0, %v1686_v18  ;;  %1604 = vmatmul.mubr.msk.bf16.gmra.mxu1 %vm410_vm0, %v1694_v19  ;;  %v2053_v19 = vadd.s32 %v1944_v23, %v813_v60  ;;  %vm872_vm0 = vcmp.lt.s32.totalorder %v2032_v7, 1024 }
  0x41   : > { %vm878_vm15 = vcmp.lt.s32.totalorder %v2053_v19, 1024 }
  0xe7   : > { %v1577_v26 = vpop.f32.mrf.mxu0  ;;  %v1593_v29 = vpop.f32.mrf.mxu1 }
  0xe8   : > { %627 = vst.msk [vmem:[#allocation2 + $0x10] sm:$0xff] %vm624_vm1, %v1577_v26  ;;  %643 = vst.msk [vmem:[#allocation2 + $0x90] sm:$0xff] %vm624_vm1, %v1593_v29  ;;  %v2072_v29 = vadd.s32 %v1944_v23, %v814_v3 }
  0xe9   : > { %v493_v34 = vpop.f32.mrf.mxu0  ;;  %v557_v38 = vpop.f32.mrf.mxu1 }
  0xea   : > { %625 = vst.msk [vmem:[#allocation2] sm:$0xff] %vm624_vm1, %v493_v34  ;;  %641 = vst.msk [vmem:[#allocation2 + $0x80] sm:$0xff] %vm624_vm1, %v557_v38 }
  0xeb   : > { %v1578_v43 = vpop.f32.mrf.mxu0  ;;  %v1594_v45 = vpop.f32.mrf.mxu1 }
  0xec   : > { %628 = vst.msk [vmem:[#allocation2 + $0x18] sm:$0xff] %vm624_vm1, %v1578_v43  ;;  %644 = vst.msk [vmem:[#allocation2 + $0x98] sm:$0xff] %vm624_vm1, %v1594_v45  ;;  %v2098_v43 = vadd.s32 %v1944_v23, %v818_v16 }
  0xed   : > { %v496_v47 = vpop.f32.mrf.mxu0  ;;  %v560_v52 = vpop.f32.mrf.mxu1 }
  0xee   : > { %626 = vst.msk [vmem:[#allocation2 + $0x8] sm:$0xff] %vm624_vm1, %v496_v47  ;;  %642 = vst.msk [vmem:[#allocation2 + $0x88] sm:$0xff] %vm624_vm1, %v560_v52 }
  0xef   : > { %v763_v57 = vld [vmem:[#allocation2 + $0x10] sm:$0xff]  ;;  %v1581_v58 = vpop.f32.mrf.mxu0  ;;  %v1597_v0 = vpop.f32.mrf.mxu1 }
  0xf0   : > { %v2018_v59 = vld [vmem:[#allocation2 + $0x90] sm:$0xff]  ;;  %v1517_v1 = vpack.c.bf16 %v763_v57, %v763_v57  ;;  %631 = vst.msk [vmem:[#allocation2 + $0x30] sm:$0xff] %vm624_vm1, %v1581_v58  ;;  %647 = vst.msk [vmem:[#allocation2 + $0xb0] sm:$0xff] %vm624_vm1, %v1597_v0  ;;  %v894_v26 = vsel %vm862_vm2, %v763_v57, 0.0  ;;  %vm876_vm2 = vcmp.lt.s32.totalorder %v2059_v22, 1024 }
  0xf1   : > { %v1533_v2 = vpack.c.bf16 %v2018_v59, %v2018_v59  ;;  %v761_v5 = vld [vmem:[#allocation2] sm:$0xff]  ;;  %v509_v6 = vpop.f32.mrf.mxu0  ;;  %v573_v10 = vpop.f32.mrf.mxu1  ;;  %v998_v45 = vmul.f32 %v894_v26, %v894_v26  ;;  %v928_v63 = vsel %vm624_vm1, %v894_v26, 0.0 }
  0xf2   : > { %v2034_v8 = vld [vmem:[#allocation2 + $0x80] sm:$0xff]  ;;  %1229 = vst.msk [vmem:[%s2015_s29 + $0x8] sm:$0xf] %vm1226_vm3, %v1517_v1  ;;  %v892_v13 = vsel %vm860_vm4, %v761_v5, 0.0  ;;  %v1515_v14 = vpack.c.bf16 %v761_v5, %v761_v5  ;;  %vm874_vm4 = vcmp.lt.s32.totalorder %v2007_v56, 1024 }
  0xf3   : > { %629 = vst.msk [vmem:[#allocation2 + $0x20] sm:$0xff] %vm624_vm1, %v509_v6  ;;  %v1531_v15 = vpack.c.bf16 %v2034_v8, %v2034_v8  ;;  %645 = vst.msk [vmem:[#allocation2 + $0xa0] sm:$0xff] %vm624_vm1, %v573_v10  ;;  %v764_v17 = vld [vmem:[#allocation2 + $0x18] sm:$0xff]  ;;  %v1582_v18 = vpop.f32.mrf.mxu0  ;;  %v1598_v25 = vpop.f32.mrf.mxu1  ;;  %v996_v33 = vmul.f32 %v892_v13, %v892_v13  ;;  %v925_v47 = vsel %vm624_vm1, %v892_v13, 0.0  ;;  %v1031_v12 = vsel %vm624_vm1, %v998_v45, 0.0 }
  0xf4   : > { %1245 = vst.msk [vmem:[%s2015_s29 + $0x48] sm:$0xf] %vm1226_vm3, %v1533_v2  ;;  %1227 = vst.msk [vmem:[%s2015_s29] sm:$0xf] %vm1226_vm3, %v1515_v14  ;;  %v1518_v28 = vpack.c.bf16 %v764_v17, %v764_v17  ;;  %v2078_v35 = vld [vmem:[#allocation2 + $0x98] sm:$0xff]  ;;  %v895_v40 = vsel %vm863_vm5, %v764_v17, 0.0 }
  0xf5   : > { %632 = vst.msk [vmem:[#allocation2 + $0x38] sm:$0xff] %vm624_vm1, %v1582_v18  ;;  %648 = vst.msk [vmem:[#allocation2 + $0xb8] sm:$0xff] %vm624_vm1, %v1598_v25  ;;  %v762_v34 = vld [vmem:[#allocation2 + $0x8] sm:$0xff]  ;;  %v512_v27 = vpop.f32.mrf.mxu0  ;;  %v576_v38 = vpop.f32.mrf.mxu1  ;;  %v1534_v61 = vpack.c.bf16 %v2078_v35, %v2078_v35  ;;  %v1028_v0 = vsel %vm624_vm1, %v996_v33, 0.0  ;;  %v999_v1 = vmul.f32 %v895_v40, %v895_v40  ;;  %v930_v13 = vsel %vm624_vm1, %v895_v40, 0.0 }
  0xf6   : > { %1243 = vst.msk [vmem:[%s2015_s29 + $0x40] sm:$0xf] %vm1226_vm3, %v1531_v15  ;;  %1230 = vst.msk [vmem:[%s2015_s29 + $0xc] sm:$0xf] %vm1226_vm3, %v1518_v28  ;;  %v893_v41 = vsel %vm861_vm6, %v762_v34, 0.0  ;;  %v1516_v42 = vpack.c.bf16 %v762_v34, %v762_v34  ;;  %v2129_v17 = vadd.s32 200, %v1940_v21 }
  0xf7   : > { %630 = vst.msk [vmem:[#allocation2 + $0x28] sm:$0xff] %vm624_vm1, %v512_v27  ;;  %646 = vst.msk [vmem:[#allocation2 + $0xa8] sm:$0xff] %vm624_vm1, %v576_v38  ;;  %v926_v31 = vsel %vm624_vm1, %v893_v41, 0.0  ;;  %v997_v51 = vmul.f32 %v893_v41, %v893_v41  ;;  %v767_v52 = vld [vmem:[#allocation2 + $0x30] sm:$0xff]  ;;  %v1585_v57 = vpop.f32.mrf.mxu0  ;;  %v1601_v32 = vpop.f32.mrf.mxu1  ;;  %v1033_v33 = vsel %vm624_vm1, %v999_v1, 0.0  ;;  %v2143_v41 = vadd.s32 208, %v1940_v21 }
  0xf8   : > { %v927_v58 = vadd.f32 %v926_v31, %v925_v47  ;;  %1228 = vst.msk [vmem:[%s2015_s29 + $0x4] sm:$0xf] %vm1226_vm3, %v1516_v42  ;;  %v1521_v60 = vpack.c.bf16 %v767_v52, %v767_v52  ;;  %1246 = vst.msk [vmem:[%s2015_s29 + $0x4c] sm:$0xf] %vm1226_vm3, %v1534_v61  ;;  %v898_v25 = vsel %vm866_vm8, %v767_v52, 0.0  ;;  %v2162_v1 = vadd.s32 216, %v1940_v21 }
  0xf9   : > { %635 = vst.msk [vmem:[#allocation2 + $0x50] sm:$0xff] %vm624_vm1, %v1585_v57  ;;  %651 = vst.msk [vmem:[#allocation2 + $0xd0] sm:$0xff] %vm624_vm1, %v1601_v32  ;;  %v1029_v2 = vsel %vm624_vm1, %v997_v51, 0.0  ;;  %v525_v4 = vpop.f32.mrf.mxu0  ;;  %v589_v5 = vpop.f32.mrf.mxu1  ;;  %v1002_v48 = vmul.f32 %v898_v25, %v898_v25  ;;  %vm875_vm5 = vcmp.lt.s32.totalorder %v2056_v20, 1024  ;;  %vm877_vm6 = vcmp.lt.s32.totalorder %v2075_v30, 1024  ;;  %v2205_v54 = vld [vmem:[#allocation2 + $0xb0] sm:$0xff] }
  0xfa   : > { %v765_v3 = vld [vmem:[#allocation2 + $0x20] sm:$0xff]  ;;  %v929_v6 = vadd.f32 %v928_v63, %v927_v58  ;;  %v1030_v9 = vadd.f32 %v1029_v2, %v1028_v0  ;;  %1233 = vst.msk [vmem:[%s2015_s29 + $0x18] sm:$0xf] %vm1226_vm3, %v1521_v60  ;;  %v2158_v0 = vld [vmem:[#allocation2 + $0x88] sm:$0xff]  ;;  %v936_v2 = vsel %vm624_vm1, %v898_v25, 0.0  ;;  %vm879_vm8 = vcmp.lt.s32.totalorder %v2072_v29, 1024 }
  0xfb   : > { %v896_v10 = vsel %vm864_vm7, %v765_v3, 0.0  ;;  %v1519_v11 = vpack.c.bf16 %v765_v3, %v765_v3  ;;  %633 = vst.msk [vmem:[#allocation2 + $0x40] sm:$0xff] %vm624_vm1, %v525_v4  ;;  %649 = vst.msk [vmem:[#allocation2 + $0xc0] sm:$0xff] %vm624_vm1, %v589_v5  ;;  %v1586_v16 = vpop.f32.mrf.mxu0  ;;  %v1602_v44 = vpop.f32.mrf.mxu1  ;;  %vm873_vm7 = vcmp.lt.s32.totalorder %v2062_v24, 1024  ;;  %v1532_v53 = vpack.c.bf16 %v2158_v0, %v2158_v0 }
  0xfc   : > { %v1000_v14 = vmul.f32 %v896_v10, %v896_v10  ;;  %v768_v15 = vld [vmem:[#allocation2 + $0x38] sm:$0xff]  ;;  %v1032_v18 = vadd.f32 %v1031_v12, %v1030_v9  ;;  %v931_v26 = vadd.f32 %v930_v13, %v929_v6  ;;  %636 = vst.msk [vmem:[#allocation2 + $0x58] sm:$0xff] %vm624_vm1, %v1586_v16  ;;  %652 = vst.msk [vmem:[#allocation2 + $0xd8] sm:$0xff] %vm624_vm1, %v1602_v44  ;;  %v932_v34 = vsel %vm624_vm1, %v896_v10, 0.0 }
  0xfd   : > { %1231 = vst.msk [vmem:[%s2015_s29 + $0x10] sm:$0xf] %vm1226_vm3, %v1519_v11  ;;  %v1522_v28 = vpack.c.bf16 %v768_v15, %v768_v15  ;;  %v899_v27 = vsel %vm867_vm9, %v768_v15, 0.0  ;;  %v528_v40 = vpop.f32.mrf.mxu0  ;;  %v592_v46 = vpop.f32.mrf.mxu1  ;;  %v2169_v10 = vadd.s32 %v1944_v23, %v2110_v62  ;;  %v1039_v62 = vsel %vm624_vm1, %v1002_v48, 0.0  ;;  %1244 = vst.msk [vmem:[%s2015_s29 + $0x44] sm:$0xf] %vm1226_vm3, %v1532_v53 }
  0xfe   : > { %v766_v38 = vld [vmem:[#allocation2 + $0x28] sm:$0xff]  ;;  %v933_v42 = vadd.f32 %v932_v34, %v931_v26  ;;  %v1034_v45 = vadd.f32 %v1033_v33, %v1032_v18  ;;  %634 = vst.msk [vmem:[#allocation2 + $0x48] sm:$0xff] %vm624_vm1, %v528_v40  ;;  %650 = vst.msk [vmem:[#allocation2 + $0xc8] sm:$0xff] %vm624_vm1, %v592_v46  ;;  %v1035_v51 = vsel %vm624_vm1, %v1000_v14, 0.0  ;;  %v1003_v3 = vmul.f32 %v899_v27, %v899_v27  ;;  %v2247_v56 = vld [vmem:[#allocation2 + $0xb8] sm:$0xff] }
  0xff   : > { %1234 = vst.msk [vmem:[%s2015_s29 + $0x1c] sm:$0xf] %vm1226_vm3, %v1522_v28  ;;  %v897_v47 = vsel %vm865_vm10, %v766_v38, 0.0  ;;  %v1520_v31 = vpack.c.bf16 %v766_v38, %v766_v38  ;;  %v1589_v58 = vpop.f32.mrf.mxu0  ;;  %v1605_v60 = vpop.f32.mrf.mxu1  ;;  %v938_v15 = vsel %vm624_vm1, %v899_v27, 0.0  ;;  %vm880_vm9 = vcmp.lt.s32.totalorder %v2084_v37, 1024  ;;  %v782_v20 = vld [vmem:[#allocation2 + $0xa8] sm:$0xff] }
 0x100   : > { %v934_v52 = vsel %vm624_vm1, %v897_v47, 0.0  ;;  %v1001_v57 = vmul.f32 %v897_v47, %v897_v47  ;;  %v771_v32 = vld [vmem:[#allocation2 + $0x50] sm:$0xff]  ;;  %v1036_v61 = vadd.f32 %v1035_v51, %v1034_v45  ;;  %639 = vst.msk [vmem:[#allocation2 + $0x70] sm:$0xff] %vm624_vm1, %v1589_v58  ;;  %655 = vst.msk [vmem:[#allocation2 + $0xf0] sm:$0xff] %vm624_vm1, %v1605_v60  ;;  %v1041_v27 = vsel %vm624_vm1, %v1003_v3, 0.0 }
 0x101   : > { %v935_v63 = vadd.f32 %v934_v52, %v933_v42  ;;  %1232 = vst.msk [vmem:[%s2015_s29 + $0x14] sm:$0xf] %vm1226_vm3, %v1520_v31  ;;  %v1525_v49 = vpack.c.bf16 %v771_v32, %v771_v32  ;;  %v541_v6 = vpop.f32.mrf.mxu0  ;;  %v605_v9 = vpop.f32.mrf.mxu1  ;;  %v902_v28 = vsel %vm870_vm12, %v771_v32, 0.0  ;;  %v2198_v45 = vadd.s32 %v1944_v23, %v2129_v17 }
 0x102   : > { %v1037_v4 = vsel %vm624_vm1, %v1001_v57, 0.0  ;;  %v769_v5 = vld [vmem:[#allocation2 + $0x40] sm:$0xff]  ;;  %637 = vst.msk [vmem:[#allocation2 + $0x60] sm:$0xff] %vm624_vm1, %v541_v6  ;;  %653 = vst.msk [vmem:[#allocation2 + $0xe0] sm:$0xff] %vm624_vm1, %v605_v9  ;;  %v1006_v52 = vmul.f32 %v902_v28, %v902_v28  ;;  %vm881_vm10 = vcmp.lt.s32.totalorder %v2087_v39, 1024  ;;  %vm883_vm12 = vcmp.lt.s32.totalorder %v2098_v43, 1024 }
 0x103   : > { %v937_v11 = vadd.f32 %v936_v2, %v935_v63  ;;  %v1038_v12 = vadd.f32 %v1037_v4, %v1036_v61  ;;  %1237 = vst.msk [vmem:[%s2015_s29 + $0x28] sm:$0xf] %vm1226_vm3, %v1525_v49  ;;  %v900_v13 = vsel %vm868_vm11, %v769_v5, 0.0  ;;  %v1523_v14 = vpack.c.bf16 %v769_v5, %v769_v5  ;;  %v772_v44 = vld [vmem:[#allocation2 + $0x58] sm:$0xff]  ;;  %v1590_v18 = vpop.f32.mrf.mxu0  ;;  %v1606_v25 = vpop.f32.mrf.mxu1  ;;  %v785_v29 = vld [vmem:[#allocation2 + $0xc0] sm:$0xff] }
 0x104   : > { %v1004_v16 = vmul.f32 %v900_v13, %v900_v13  ;;  %v1526_v34 = vpack.c.bf16 %v772_v44, %v772_v44  ;;  %640 = vst.msk [vmem:[#allocation2 + $0x78] sm:$0xff] %vm624_vm1, %v1590_v18  ;;  %656 = vst.msk [vmem:[#allocation2 + $0xf8] sm:$0xff] %vm624_vm1, %v1606_v25  ;;  %v940_v38 = vsel %vm624_vm1, %v900_v13, 0.0  ;;  %v903_v40 = vsel %vm871_vm13, %v772_v44, 0.0  ;;  %v2237_v18 = vld [vmem:[#allocation2 + $0xa0] sm:$0xff] }
 0x105   : > { %v1040_v26 = vadd.f32 %v1039_v62, %v1038_v12  ;;  %v939_v33 = vadd.f32 %v938_v15, %v937_v11  ;;  %1235 = vst.msk [vmem:[%s2015_s29 + $0x20] sm:$0xf] %vm1226_vm3, %v1523_v14  ;;  %v770_v46 = vld [vmem:[#allocation2 + $0x48] sm:$0xff]  ;;  %v544_v42 = vpop.f32.mrf.mxu0  ;;  %v608_v50 = vpop.f32.mrf.mxu1  ;;  %v2215_v63 = vsel %vm878_vm15, %v2018_v59, 0.0  ;;  %v944_v49 = vsel %vm624_vm1, %v902_v28, 0.0 }
 0x106   : > { %1238 = vst.msk [vmem:[%s2015_s29 + $0x2c] sm:$0xf] %vm1226_vm3, %v1526_v34  ;;  %v901_v48 = vsel %vm869_vm14, %v770_v46, 0.0  ;;  %v1524_v51 = vpack.c.bf16 %v770_v46, %v770_v46  ;;  %v1043_v57 = vsel %vm624_vm1, %v1004_v16, 0.0  ;;  %v1007_v2 = vmul.f32 %v903_v40, %v903_v40 }
 0x107   : > { %v941_v47 = vadd.f32 %v940_v38, %v939_v33  ;;  %v1042_v31 = vadd.f32 %v1041_v27, %v1040_v26  ;;  %638 = vst.msk [vmem:[#allocation2 + $0x68] sm:$0xff] %vm624_vm1, %v544_v42  ;;  %654 = vst.msk [vmem:[#allocation2 + $0xe8] sm:$0xff] %vm624_vm1, %v608_v50  ;;  %v942_v17 = vsel %vm624_vm1, %v901_v48, 0.0  ;;  %v1005_v32 = vmul.f32 %v901_v48, %v901_v48  ;;  %v775_v58 = vld [vmem:[#allocation2 + $0x70] sm:$0xff] }
 0x108   : > { %1236 = vst.msk [vmem:[%s2015_s29 + $0x24] sm:$0xf] %vm1226_vm3, %v1524_v51  ;;  %v1529_v55 = vpack.c.bf16 %v775_v58, %v775_v58  ;;  %v1537_v5 = vpack.c.bf16 %v2205_v54, %v2205_v54  ;;  %v1047_v11 = vsel %vm624_vm1, %v1006_v52, 0.0  ;;  %v946_v12 = vsel %vm624_vm1, %v903_v40, 0.0 }
 0x109   : > { %v1044_v60 = vadd.f32 %v1043_v57, %v1042_v31  ;;  %v943_v61 = vadd.f32 %v942_v17, %v941_v47  ;;  %v1045_v3 = vsel %vm624_vm1, %v1005_v32, 0.0  ;;  %v773_v4 = vld [vmem:[#allocation2 + $0x60] sm:$0xff]  ;;  %v908_v62 = vsel %vm876_vm2, %v2034_v8, 0.0 }
 0x10a   : > { %1241 = vst.msk [vmem:[%s2015_s29 + $0x38] sm:$0xf] %vm1226_vm3, %v1529_v55  ;;  %v904_v59 = vsel %vm872_vm0, %v773_v4, 0.0  ;;  %v1527_v19 = vpack.c.bf16 %v773_v4, %v773_v4  ;;  %1249 = vst.msk [vmem:[%s2015_s29 + $0x58] sm:$0xf] %vm1226_vm3, %v1537_v5  ;;  %v906_v16 = vsel %vm874_vm4, %v775_v58, 0.0  ;;  %v1535_v24 = vpack.c.bf16 %v2237_v18, %v2237_v18 }
 0x10b   : > { %v945_v6 = vadd.f32 %v944_v49, %v943_v61  ;;  %v1046_v9 = vadd.f32 %v1045_v3, %v1044_v60  ;;  %v1008_v13 = vmul.f32 %v904_v59, %v904_v59  ;;  %v776_v14 = vld [vmem:[#allocation2 + $0x78] sm:$0xff]  ;;  %v1049_v53 = vsel %vm624_vm1, %v1007_v2, 0.0 }
 0x10c   : > { %1239 = vst.msk [vmem:[%s2015_s29 + $0x30] sm:$0xf] %vm1226_vm3, %v1527_v19  ;;  %v1530_v44 = vpack.c.bf16 %v776_v14, %v776_v14  ;;  %v948_v25 = vsel %vm624_vm1, %v904_v59, 0.0  ;;  %v907_v8 = vsel %vm875_vm5, %v776_v14, 0.0  ;;  %v909_v26 = vsel %vm877_vm6, %v2158_v0, 0.0 }
 0x10d   : > { %v1048_v15 = vadd.f32 %v1047_v11, %v1046_v9  ;;  %v947_v7 = vadd.f32 %v946_v12, %v945_v6  ;;  %v1010_v38 = vmul.f32 %v906_v16, %v906_v16  ;;  %v1051_v30 = vsel %vm624_vm1, %v1008_v13, 0.0  ;;  %1247 = vst.msk [vmem:[%s2015_s29 + $0x50] sm:$0xf] %vm1226_vm3, %v1535_v24  ;;  %v2296_v12 = vld [vmem:[#allocation2 + $0xd0] sm:$0xff] }
 0x10e   : > { %v774_v22 = vld [vmem:[#allocation2 + $0x68] sm:$0xff]  ;;  %1242 = vst.msk [vmem:[%s2015_s29 + $0x3c] sm:$0xf] %vm1226_vm3, %v1530_v44  ;;  %v1538_v50 = vpack.c.bf16 %v2247_v56, %v2247_v56  ;;  %v952_v47 = vsel %vm624_vm1, %v906_v16, 0.0  ;;  %v1011_v31 = vmul.f32 %v907_v8, %v907_v8  ;;  %vm882_vm11 = vcmp.lt.s32.totalorder %v2081_v36, 1024  ;;  %v2301_v16 = vld [vmem:[#allocation2 + $0xd8] sm:$0xff] }
 0x10f   : > { %v949_v28 = vadd.f32 %v948_v25, %v947_v7  ;;  %v1050_v33 = vadd.f32 %v1049_v53, %v1048_v15  ;;  %v905_v34 = vsel %vm873_vm7, %v774_v22, 0.0  ;;  %v1528_v27 = vpack.c.bf16 %v774_v22, %v774_v22  ;;  %v2303_v7 = vld [vmem:[#allocation2 + $0xe0] sm:$0xff]  ;;  %v2311_v22 = vld [vmem:[#allocation2 + $0xf0] sm:$0xff] }
 0x110   : > { %v950_v0 = vsel %vm624_vm1, %v905_v34, 0.0  ;;  %v1009_v40 = vmul.f32 %v905_v34, %v905_v34  ;;  %v1536_v51 = vpack.c.bf16 %v782_v20, %v782_v20  ;;  %v1014_v52 = vmul.f32 %v2215_v63, %v2215_v63  ;;  %1250 = vst.msk [vmem:[%s2015_s29 + $0x5c] sm:$0xf] %vm1226_vm3, %v1538_v50 }
 0x111   : > { %v1052_v46 = vadd.f32 %v1051_v30, %v1050_v33  ;;  %v951_v42 = vadd.f32 %v950_v0, %v949_v28  ;;  %1240 = vst.msk [vmem:[%s2015_s29 + $0x34] sm:$0xf] %vm1226_vm3, %v1528_v27  ;;  %v2273_v32 = vadd.s32 %v1944_v23, %v2143_v41  ;;  %v1055_v58 = vsel %vm624_vm1, %v1010_v38, 0.0 }
 0x112   : > { %v1053_v48 = vsel %vm624_vm1, %v1009_v40, 0.0  ;;  %v954_v60 = vsel %vm624_vm1, %v907_v8, 0.0  ;;  %v1012_v61 = vmul.f32 %v908_v62, %v908_v62  ;;  %1248 = vst.msk [vmem:[%s2015_s29 + $0x54] sm:$0xf] %vm1226_vm3, %v1536_v51  ;;  %v2281_v55 = vadd.s32 %v1944_v23, %v2162_v1  ;;  %v2309_v8 = vld [vmem:[#allocation2 + $0xe8] sm:$0xff] }
 0x113   : > { %v953_v57 = vadd.f32 %v952_v47, %v951_v42  ;;  %v1054_v17 = vadd.f32 %v1053_v48, %v1052_v46  ;;  %v911_v2 = vsel %vm879_vm8, %v2078_v35, 0.0  ;;  %v1013_v3 = vmul.f32 %v909_v26, %v909_v26  ;;  %v786_v35 = vld [vmem:[#allocation2 + $0xc8] sm:$0xff] }
 0x114   : > { %v1057_v4 = vsel %vm624_vm1, %v1011_v31, 0.0  ;;  %v956_v5 = vsel %vm624_vm1, %v908_v62, 0.0  ;;  %v823_v6 = vadd.s32 224, %v1940_v21  ;;  %v2291_v9 = vadd.s32 232, %v1940_v21 }
 0x115   : > { %v1056_v49 = vadd.f32 %v1055_v58, %v1054_v17  ;;  %v955_v41 = vadd.f32 %v954_v60, %v953_v57  ;;  %v960_v1 = vsel %vm624_vm1, %v2215_v63, 0.0  ;;  %v1063_v59 = vsel %vm624_vm1, %v1014_v52, 0.0 }
 0x116   : > { %v1059_v13 = vsel %vm624_vm1, %v1012_v61, 0.0  ;;  %v962_v14 = vsel %vm624_vm1, %v911_v2, 0.0  ;;  %v1015_v62 = vmul.f32 %v911_v2, %v911_v2  ;;  %v958_v15 = vsel %vm624_vm1, %v909_v26, 0.0  ;;  %v2313_v26 = vld [vmem:[#allocation2 + $0xf8] sm:$0xff] }
 0x117   : > { %v957_v19 = vadd.f32 %v956_v5, %v955_v41  ;;  %v1058_v11 = vadd.f32 %v1057_v4, %v1056_v49  ;;  %v1061_v53 = vsel %vm624_vm1, %v1013_v3, 0.0  ;;  %v912_v25 = vsel %vm880_vm9, %v2237_v18, 0.0 }
 0x118   : > { %v913_v28 = vsel %vm881_vm10, %v782_v20, 0.0  ;;  %v1539_v33 = vpack.c.bf16 %v785_v29, %v785_v29  ;;  %v1540_v34 = vpack.c.bf16 %v786_v35, %v786_v35  ;;  %v1541_v27 = vpack.c.bf16 %v2296_v12, %v2296_v12 }
 0x119   : > { %v959_v63 = vadd.f32 %v958_v15, %v957_v19  ;;  %v1060_v44 = vadd.f32 %v1059_v13, %v1058_v11  ;;  %v1542_v38 = vpack.c.bf16 %v2301_v16, %v2301_v16  ;;  %v1543_v30 = vpack.c.bf16 %v2303_v7, %v2303_v7 }
 0x11a   : > { %v1016_v0 = vmul.f32 %v912_v25, %v912_v25  ;;  %v1544_v39 = vpack.c.bf16 %v2309_v8, %v2309_v8  ;;  %v1545_v20 = vpack.c.bf16 %v2311_v22, %v2311_v22  ;;  %v1546_v40 = vpack.c.bf16 %v2313_v26, %v2313_v26  ;;  %1251 = vst.msk [vmem:[%s2015_s29 + $0x60] sm:$0xf] %vm1226_vm3, %v1539_v33 }
 0x11b   : > { %v961_v37 = vadd.f32 %v960_v1, %v959_v63  ;;  %v1062_v18 = vadd.f32 %v1061_v53, %v1060_v44  ;;  %1252 = vst.msk [vmem:[%s2015_s29 + $0x64] sm:$0xf] %vm1226_vm3, %v1540_v34  ;;  %1253 = vst.msk [vmem:[%s2015_s29 + $0x68] sm:$0xf] %vm1226_vm3, %v1541_v27  ;;  %v914_v42 = vsel %vm882_vm11, %v2205_v54, 0.0  ;;  %v825_v50 = vadd.s32 240, %v1940_v21 }
 0x11c   : > { %1254 = vst.msk [vmem:[%s2015_s29 + $0x6c] sm:$0xf] %vm1226_vm3, %v1542_v38  ;;  %1255 = vst.msk [vmem:[%s2015_s29 + $0x70] sm:$0xf] %vm1226_vm3, %v1543_v30  ;;  %v1065_v47 = vsel %vm624_vm1, %v1015_v62, 0.0  ;;  %v964_v31 = vsel %vm624_vm1, %v912_v25, 0.0  ;;  %v1017_v48 = vmul.f32 %v913_v28, %v913_v28  ;;  %v1018_v57 = vmul.f32 %v914_v42, %v914_v42 }
 0x11d   : > { %v1064_v46 = vadd.f32 %v1063_v59, %v1062_v18  ;;  %v963_v24 = vadd.f32 %v962_v14, %v961_v37  ;;  %vm884_vm13 = vcmp.lt.s32.totalorder %v2169_v10, 1024  ;;  %1256 = vst.msk [vmem:[%s2015_s29 + $0x74] sm:$0xf] %vm1226_vm3, %v1544_v39  ;;  %1257 = vst.msk [vmem:[%s2015_s29 + $0x78] sm:$0xf] %vm1226_vm3, %v1545_v20  ;;  %v826_v54 = vadd.s32 248, %v1940_v21 }
 0x11e   : > { %1258 = vst.msk [vmem:[%s2015_s29 + $0x7c] sm:$0xf] %vm1226_vm3, %v1546_v40  ;;  %v915_v51 = vsel %vm883_vm12, %v2247_v56, 0.0  ;;  %v1067_v17 = vsel %vm624_vm1, %v1016_v0, 0.0  ;;  %v966_v58 = vsel %vm624_vm1, %v913_v28, 0.0  ;;  %vm885_vm14 = vcmp.lt.s32.totalorder %v2198_v45, 1024 }
 0x11f   : > { %v965_v36 = vadd.f32 %v964_v31, %v963_v24  ;;  %v1066_v52 = vadd.f32 %v1065_v47, %v1064_v46  ;;  %vm886_vm15 = vcmp.lt.s32.totalorder %v2273_v32, 1024  ;;  %v916_v10 = vsel %vm884_vm13, %v785_v29, 0.0  ;;  %s1701_s29 = scalar_lea.vmem %s1700_s26, 32 }
 0x120   : > { %v856_v49 = vadd.s32 %v1944_v23, %v823_v6  ;;  %v968_v21 = vsel %vm624_vm1, %v914_v42, 0.0  ;;  %v1019_v2 = vmul.f32 %v915_v51, %v915_v51  ;;  %v1069_v43 = vsel %vm624_vm1, %v1017_v48, 0.0  ;;  %p1703_p2 = scmp.lt.s32.totalorder %s1701_s29, %s1695_s22 }
 0x121   : > { %v967_v60 = vadd.f32 %v966_v58, %v965_v36  ;;  %v1068_v61 = vadd.f32 %v1067_v17, %v1066_v52  ;;  %vm887_vm3 = vcmp.lt.s32.totalorder %v2281_v55, 1024  ;;  %v917_v56 = vsel %vm885_vm14, %v786_v35, 0.0 }
 0x122   : > { %v857_v45 = vadd.s32 %v1944_v23, %v2291_v9  ;;  %v970_v4 = vsel %vm624_vm1, %v915_v51, 0.0  ;;  %v1020_v5 = vmul.f32 %v916_v10, %v916_v10  ;;  %v1071_v1 = vsel %vm624_vm1, %v1018_v57, 0.0  ;;  %p1704_p3 = por %p1703_p2, %p1702_p1 }
 0x123   : > { %v969_v41 = vadd.f32 %v968_v21, %v967_v60  ;;  %v1070_v3 = vadd.f32 %v1069_v43, %v1068_v61  ;;  %v858_v6 = vadd.s32 %v1944_v23, %v825_v50  ;;  %v918_v59 = vsel %vm886_vm15, %v2296_v12, 0.0 }
 0x124   : > { %vm888_vm0 = vcmp.lt.s32.totalorder %v856_v49, 1024  ;;  %v972_v29 = vsel %vm624_vm1, %v916_v10, 0.0  ;;  %v1021_v35 = vmul.f32 %v917_v56, %v917_v56  ;;  %v1073_v13 = vsel %vm624_vm1, %v1019_v2, 0.0  ;;  %p1705_p5 = pnand %p1704_p3, %p1698_p0 }
 0x125   : > { %v971_v19 = vadd.f32 %v970_v4, %v969_v41  ;;  %v1072_v11 = vadd.f32 %v1071_v1, %v1070_v3  ;;  %v859_v9 = vadd.s32 %v1944_v23, %v826_v54  ;;  %v919_v14 = vsel %vm887_vm3, %v2301_v16, 0.0 }
 0x126   : > { %vm889_vm2 = vcmp.lt.s32.totalorder %v857_v45, 1024  ;;  %v974_v32 = vsel %vm624_vm1, %v917_v56, 0.0  ;;  %v1022_v12 = vmul.f32 %v918_v59, %v918_v59  ;;  %v1075_v63 = vsel %vm624_vm1, %v1020_v5, 0.0 }
 0x127   : > { %v973_v62 = vadd.f32 %v972_v29, %v971_v19  ;;  %v1074_v15 = vadd.f32 %v1073_v13, %v1072_v11  ;;  %v920_v44 = vsel %vm888_vm0, %v2303_v7, 0.0  ;;  %vm890_vm4 = vcmp.lt.s32.totalorder %v858_v6, 1024 }
 0x128   : > { %v976_v28 = vsel %vm624_vm1, %v918_v59, 0.0  ;;  %v1023_v23 = vmul.f32 %v919_v14, %v919_v14  ;;  %v1077_v33 = vsel %vm624_vm1, %v1021_v35, 0.0  ;;  %v921_v55 = vsel %vm889_vm2, %v2309_v8, 0.0 }
 0x129   : > { %v975_v53 = vadd.f32 %v974_v32, %v973_v62  ;;  %v1076_v25 = vadd.f32 %v1075_v63, %v1074_v15  ;;  %vm891_vm5 = vcmp.lt.s32.totalorder %v859_v9, 1024  ;;  %v978_v27 = vsel %vm624_vm1, %v919_v14, 0.0 }
 0x12a   : > { %v1024_v37 = vmul.f32 %v920_v44, %v920_v44  ;;  %v1079_v18 = vsel %vm624_vm1, %v1022_v12, 0.0  ;;  %v922_v7 = vsel %vm890_vm4, %v2311_v22, 0.0  ;;  %v980_v0 = vsel %vm624_vm1, %v920_v44, 0.0 }
 0x12b   : > { %v977_v16 = vadd.f32 %v976_v28, %v975_v53  ;;  %v1078_v34 = vadd.f32 %v1077_v33, %v1076_v25  ;;  %v1025_v39 = vmul.f32 %v921_v55, %v921_v55  ;;  %v1081_v20 = vsel %vm624_vm1, %v1023_v23, 0.0 }
 0x12c   : > { %v923_v40 = vsel %vm891_vm5, %v2313_v26, 0.0  ;;  %v982_v42 = vsel %vm624_vm1, %v921_v55, 0.0  ;;  %v1026_v24 = vmul.f32 %v922_v7, %v922_v7  ;;  %v1083_v50 = vsel %vm624_vm1, %v1024_v37, 0.0 }
 0x12d   : > { %v979_v38 = vadd.f32 %v978_v27, %v977_v16  ;;  %v1080_v30 = vadd.f32 %v1079_v18, %v1078_v34  ;;  %v984_v22 = vsel %vm624_vm1, %v922_v7, 0.0  ;;  %v1027_v48 = vmul.f32 %v923_v40, %v923_v40 }
 0x12e   : > { %v1085_v36 = vsel %vm624_vm1, %v1025_v39, 0.0  ;;  %v986_v26 = vsel %vm624_vm1, %v923_v40, 0.0  ;;  %v1087_v52 = vsel %vm624_vm1, %v1026_v24, 0.0 }
 0x12f   : > { %v981_v8 = vadd.f32 %v980_v0, %v979_v38  ;;  %v1082_v46 = vadd.f32 %v1081_v20, %v1080_v30  ;;  %v1089_v58 = vsel %vm624_vm1, %v1027_v48, 0.0  ;;  %vm994_vm1 = vcmask 253952  }
 0x131   : > { %v983_v47 = vadd.f32 %v982_v42, %v981_v8  ;;  %v1084_v31 = vadd.f32 %v1083_v50, %v1082_v46 }
 0x133   : > { %v985_v54 = vadd.f32 %v984_v22, %v983_v47  ;;  %v1086_v51 = vadd.f32 %v1085_v36, %v1084_v31 }
 0x135   : > { %v987_v57 = vadd.f32 %v986_v26, %v985_v54  ;;  %v1088_v17 = vadd.f32 %v1087_v52, %v1086_v51 }
 0x137   : > { %v988_v10 = vrot.slane %v987_v57, 4  ;;  %v1090_v60 = vadd.f32 %v1089_v58, %v1088_v17 }
 0x139   : > { %v989_v61 = vadd.f32 %v988_v10, %v987_v57  ;;  %v1091_v49 = vrot.slane %v1090_v60, 4 }
 0x13b   : > { %v990_v21 = vrot.slane %v989_v61, 2  ;;  %v1092_v2 = vadd.f32 %v1091_v49, %v1090_v60 }
 0x13d   : > { %v991_v43 = vadd.f32 %v990_v21, %v989_v61  ;;  %v1093_v56 = vrot.slane %v1092_v2, 2 }
 0x13f   : > { %v992_v41 = vrot.slane %v991_v43, 1  ;;  %v1094_v3 = vadd.f32 %v1093_v56, %v1092_v2 }
 0x141   : > { %v993_v45 = vadd.f32 %v992_v41, %v991_v43  ;;  %v1095_v4 = vrot.slane %v1094_v3, 1 }
 0x143   : > { %995 = vst.msk [vmem:[%s237_s6] sm:$0x1] %vm994_vm1, %v993_v45  ;;  %v1096_v5 = vadd.f32 %v1095_v4, %v1094_v3 }
 0x144   : > { %1708 = shalt.err (!%p1705_p5)
}
 0x145   : > { %s1709_s5 = scalar_lea.hbm %s2408_s12, 16  ;;  %s1713_s11 = scalar_lea.hbm %s2490_s3, 64 }
 0x146   : > { %p1710_p6 = scmp.ne.s32.totalorder %s2408_s12, %s1709_s5  ;;  %p1714_p10 = scmp.lt.s32.totalorder %s2408_s12, %s2490_s3 }
 0x147   : > { %p1715_p11 = scmp.lt.s32.totalorder %s1713_s11, %s1709_s5 }
 0x148   : > { %p1711_p7 = pnand %p1710_p6, %p1870_p4 }
 0x149   : > { %p1716_p12 = por %p1715_p11, %p1714_p10 }
 0x14a   : > { %p1712_p9 = pneg %p1711_p7 }
 0x14c   : > { %p1717_p13 = pnand %p1716_p12, %p1712_p9 }
 0x14e   : > { %1720 = shalt.err (!%p1717_p13)
}
 0x14f   : > { %1615 = dma.vmem_to_hbm [thread:$0]  (%p1870_p4), %s2410_s7, 16, %s2408_s12, %s1265_s21   ;;  %1097 = vst.msk [vmem:[%s243_s8] sm:$0x1] %vm994_vm1, %v1096_v5 }
 0x150   : > { %s1269_s22 = scalar_lea.sflag [#allocation6], %s2398_s30  ;;  %s1721_s24 = scalar_lea.vmem %s2418_s9, 16 }
 0x151   : > { %p1722_p0 = scmp.ne.s32.totalorder %s2418_s9, %s1721_s24  ;;  %s1804_s26 = smov [#allocation5]  }
 0x152   : > { %s1725_s29 = sshll.u32 %s1804_s26, 4  ;;  %s1726_s29 = int_to_ptr.vmem [resolvable:$false] %s1725_s29 }
 0x153   : > { %p1723_p1 = pnand %p1722_p0, %p1870_p4  ;;  %s1727_s5 = scalar_lea.vmem %s1726_s29, 32 }
 0x154   : > { %p1728_p3 = scmp.lt.s32.totalorder %s2418_s9, %s1726_s29  ;;  %p1729_p5 = scmp.lt.s32.totalorder %s1727_s5, %s1721_s24 }
 0x155   : > { %p1724_p2 = pneg %p1723_p1 }
 0x156   : > { %p1730_p6 = por %p1729_p5, %p1728_p3 }
 0x158   : > { %p1731_p7 = pnand %p1730_p6, %p1724_p2 }
 0x15a   : > { %1734 = shalt.err (!%p1731_p7)
}
 0x15b   : > { %s1735_s7 = scalar_lea.hbm %s2416_s14, 16  ;;  %s1739_s12 = scalar_lea.hbm %s2491_s4, 64 }
 0x15c   : > { %p1736_p9 = scmp.ne.s32.totalorder %s2416_s14, %s1735_s7  ;;  %p1740_p12 = scmp.lt.s32.totalorder %s2416_s14, %s2491_s4 }
 0x15d   : > { %p1741_p13 = scmp.lt.s32.totalorder %s1739_s12, %s1735_s7 }
 0x15e   : > { %p1737_p10 = pnand %p1736_p9, %p1870_p4 }
 0x15f   : > { %p1742_p0 = por %p1741_p13, %p1740_p12 }
 0x160   : > { %p1738_p11 = pneg %p1737_p10 }
 0x162   : > { %p1743_p1 = pnand %p1742_p0, %p1738_p11 }
 0x164   : > { %1746 = shalt.err (!%p1743_p1)
}
 0x165   : > { %1616 = dma.vmem_to_hbm [thread:$0]  (%p1870_p4), %s2418_s9, 16, %s2416_s14, %s1269_s22  }
 0x166 PF: > { %p1626_p2 = scmp.ge.s32.totalorder %s1801_s20, 2  ;;  %s1318_s10 = sand.u32 1, %s1781_s15  }
 0x167   : > { %s1319_s11 = scalar_lea.sflag [#allocation4], %s1318_s10 }
 0x168   : > { %p1620_p3 = pnand %p1626_p2, %p1877_p8 }
 0x16a   : > { %p1621_p5 = pneg %p1620_p3 }
 0x16c   : > { %1772 = dma.done.wait (%p1621_p5), %s1319_s11, 16  }
 0x16d   : > { %1774 = vsyncadd (%p1621_p5), %s1319_s11, 4294967280  ;;  %s1327_s18 = scalar_lea.sflag [#allocation6], %s1318_s10 }
 0x16e   : > { %1776 = dma.done.wait (%p1621_p5), %s1327_s18, 16  }
 0x16f   : > { %1778 = vsyncadd (%p1621_p5), %s1327_s18, 4294967280  ;;  %s21_s20 = sadd.s32 1, %s1801_s20   ;;  %s2494_s15 = smov %s1785_s16 }
 0x170   : > { %p18_p6 = scmp.ge.s32.totalorder %s21_s20, 6   ;;  %s2495_s16 = smov %s1789_s17 }
 0x171   : > { %s2496_s17 = smov %s1883_s28  ;;  %s2497_s18 = smov %s1797_s19 }
 0x172   : > { %s2498_s19 = smov %s2500_s23  ;;  %20 = sbr.rel (!%p18_p6) target bundleno = 6 (0x6), region = 107 }
 0x177   :  { %1331 = vsyncpa [#allocation4], 1 }
 0x178   :  { %1333 = vsyncpa [#allocation4 + $0x1], 1 }
 0x179   :  { %1334 = vsyncpa [#allocation6], 1 }
 0x17a   :  { %1336 = vsyncpa [#allocation6 + $0x1], 1 }

</bundles_post_ra>
